<compile_context>
chip_gen: v7x
topology: tpu7x:2x2x1
jax: 0.10.0
libtpu: 0.0.40
codegen_flags: <defaults>
</compile_context>

<pallas_src>
from math import exp

import jax
import jax.numpy as jnp
import numpy as np
from jax.experimental import pallas as pl
from jax.experimental.pallas import tpu as pltpu

_C1 = 0.01 ** 2
_C2 = 0.03 ** 2


def _gaussian_1d(window_size: int, sigma: float) -> np.ndarray:
    # Identical to SSIM_Loss.gaussian (deterministic "parameter" init).
    g = np.array(
        [exp(-(x - window_size // 2) ** 2 / float(2 * sigma ** 2)) for x in range(window_size)],
        dtype=np.float64,
    )
    return g / g.sum()


def _band_matrix(n: int, g: np.ndarray) -> np.ndarray:
    # Banded matrix B (n, n) with B[r, c] = g[c - r + p] inside the band, so
    # that B @ X (rows) and X @ B (columns; B symmetric) realize the
    # zero-padded 1D Gaussian convolution.  Padding is implicit in the band.
    ws = len(g)
    p = ws // 2
    m = np.zeros((n, n), dtype=np.float64)
    for r in range(n):
        for c in range(max(0, r - p), min(n, r + p + 1)):
            m[r, c] = g[c - r + p]
    return m


def _ssim_block_kernel(gr_ref, gc_ref, x1_ref, x2_ref, sum_ref):
    # gr_ref: (H, H), gc_ref: (W, W) constant Gaussian band matrices.
    # x1_ref / x2_ref: (P, H, W) blocks of image planes (input dtype).
    # sum_ref: (P, 1, 1) per-plane sums of the SSIM map.
    P, H, W = x1_ref.shape
    conv_dtype = gr_ref.dtype

    # Cast after the DMA; go to a 2D (P*H, W) slab for the lane-dim matmul.
    x1 = x1_ref[...].astype(jnp.float32).reshape(P * H, W)
    x2 = x2_ref[...].astype(jnp.float32).reshape(P * H, W)

    # Fuse the six convs of the reference into ONE separable conv over the
    # stacked slab (5 conv inputs along the plane/row axis).
    s = jnp.concatenate([x1, x2, x1 * x1, x2 * x2, x1 * x2], axis=0)  # (5PH, W)
    FP = 5 * P

    # Pass over W (lane dim): single unbatched MXU matmul, M = 5P*H.
    t = jnp.dot(s.astype(conv_dtype), gc_ref[...],
                preferred_element_type=jnp.float32)                   # (5PH, W)
    # Pass over H: one minor-dim transpose (XLU), then M = 5P*W matmul.
    t = jnp.transpose(t.reshape(FP, H, W), (0, 2, 1))                 # (5P, W, H)
    c = jnp.dot(t.reshape(FP * W, H).astype(conv_dtype), gr_ref[...],
                preferred_element_type=jnp.float32)                   # (5PW, H)
    c = c.reshape(FP, W, H)   # conv results with (H, W) swapped (sum-invariant)

    mu1 = c[0 * P:1 * P]
    mu2 = c[1 * P:2 * P]
    mu1_mu2 = mu1 * mu2
    mu_sq = mu1 * mu1 + mu2 * mu2
    # sigma terms folded straight into num/den (shorter live ranges):
    #   sigma12            = c[4P:5P] - mu1_mu2
    #   sigma1_sq+sigma2_sq = c[2P:3P] + c[3P:4P] - mu_sq
    num = (2.0 * mu1_mu2 + _C1) * (2.0 * (c[4 * P:5 * P] - mu1_mu2) + _C2)
    den = (mu_sq + _C1) * (c[2 * P:3 * P] + c[3 * P:4 * P] - mu_sq + _C2)

    r = pl.reciprocal(den, approx=True)   # EUP slot (co-issues with MXU/VPU)
    r = r * (2.0 - den * r)               # one Newton step -> ~1e-8 rel error
    ssim_map = num * r                    # (P, W, H)

    # Per-plane sum of the SSIM map -> (P, 1, 1).
    sum_ref[...] = jnp.sum(
        jnp.sum(ssim_map, axis=2, keepdims=True), axis=1, keepdims=True
    )


def _pick_planes_per_step(h, w, in_itemsize, budget_bytes):
    # Rough per-plane VMEM working set per grid step (bytes):
    #   2 image inputs x 2 pipeline buffers (input dtype) + 2 f32 casts
    #   + stacked conv input + pass-1 out + transposed copy + conv out
    #   (each 5 planes, f32) + ~6 live elementwise f32 temporaries.
    per_plane = h * w * (4 * in_itemsize + (2 + 4 * 5 + 6) * 4)
    band = 2 * 2 * (h * h + w * w) * 4          # Gr, Gc, double-buffered
    p = (budget_bytes - band) // max(per_plane, 1)
    return int(max(1, min(p, 256)))


def ssim_loss(img1, img2, window_size: int = 11, size_average: bool = True,
              planes_per_step=None, conv_dtype=jnp.float32,
              vmem_budget_bytes: int = 40 * 1024 * 1024):
    """Pallas equivalent of SSIM_Loss.forward (NCHW, or 5D collapsed like PyTorch)."""
    if img1.ndim == 5:
        s = img1.shape
        img1 = img1.reshape(s[0] * s[1], s[2], s[3], s[4])
        img2 = img2.reshape(s[0] * s[1], s[2], s[3], s[4])

    N, C, H, W = img1.shape
    g = _gaussian_1d(window_size, 1.5)
    gr = jnp.asarray(_band_matrix(H, g), dtype=conv_dtype)
    gc = jnp.asarray(_band_matrix(W, g), dtype=conv_dtype)

    BC = N * C
    in_itemsize = jnp.dtype(img1.dtype).itemsize
    if planes_per_step is None:
        planes_per_step = _pick_planes_per_step(H, W, in_itemsize, vmem_budget_bytes)
    P = max(1, min(int(planes_per_step), BC))
    if BC >= 2:
        # Keep >= 2 grid blocks so the "parallel" axis can shard across both
        # v7x TensorCores (neutral on single-TC v5e/v6e).
        P = min(P, -(-BC // 2))
    BC_pad = -(-BC // P) * P
    num_blocks = BC_pad // P

    x1 = img1.reshape(BC, H, W)
    x2 = img2.reshape(BC, H, W)
    if BC_pad != BC:
        pad = ((0, BC_pad - BC), (0, 0), (0, 0))
        x1 = jnp.pad(x1, pad)   # padded planes' sums are sliced off below
        x2 = jnp.pad(x2, pad)

    est_vmem = (2 * 2 * (H * H + W * W) * 4
                + P * H * W * (4 * in_itemsize + 28 * 4))
    vmem_limit = int(min(48 * 1024 * 1024,
                         max(16 * 1024 * 1024, est_vmem * 5 // 4)))

    # TODO(synk): for large planes (>= ~512 px) tile the H/W passes with a
    # (window_size // 2)-element halo and a (T + 2*pad, T) band slice so band
    # VMEM and matmul FLOPs stay bounded instead of dense (H,H)/(W,W) matmuls.
    # TODO(synk): single-buffer the constant gr/gc inputs (pl.Buffered(1)) once
    # their footprint matters; the constant index_map already avoids re-DMA.
    plane_sums = pl.pallas_call(
        _ssim_block_kernel,
        out_shape=jax.ShapeDtypeStruct((BC_pad, 1, 1), jnp.float32),
        grid_spec=pltpu.PrefetchScalarGridSpec(
            num_scalar_prefetch=0,
            grid=(num_blocks,),
            in_specs=[
                pl.BlockSpec((H, H), lambda i: (0, 0)),
                pl.BlockSpec((W, W), lambda i: (0, 0)),
                pl.BlockSpec((P, H, W), lambda i: (i, 0, 0)),
                pl.BlockSpec((P, H, W), lambda i: (i, 0, 0)),
            ],
            out_specs=pl.BlockSpec((P, 1, 1), lambda i: (i, 0, 0)),
        ),
        compiler_params=pltpu.CompilerParams(
            dimension_semantics=("parallel",),
            vmem_limit_bytes=vmem_limit),
    )(gr, gc, x1, x2)

    sums = plane_sums.reshape(BC_pad)[:BC].reshape(N, C)
    if size_average:
        # ssim_map.mean() over all N*C*H*W elements
        return jnp.sum(sums) / (N * C * H * W)
    else:
        # ssim_map.mean(1).mean(1).mean(1) == mean over (C, H, W) per batch item
        return jnp.sum(sums, axis=1) / (C * H * W)


def _ref_ssim(img1, img2, window_size: int = 11, size_average: bool = True):
    # Independent NumPy reference (shift-based separable conv, float64).
    img1 = np.asarray(img1, dtype=np.float64)
    img2 = np.asarray(img2, dtype=np.float64)
    N, C, H, W = img1.shape
    g = _gaussian_1d(window_size, 1.5)
    ws = window_size
    p = ws // 2

    def conv(x):  # x: (BC, H, W)
        xp = np.pad(x, ((0, 0), (p, p), (p, p)))
        acc = np.zeros((x.shape[0], H, W + 2 * p))
        for a in range(ws):
            acc += g[a] * xp[:, a:a + H, :]
        out = np.zeros((x.shape[0], H, W))
        for b in range(ws):
            out += g[b] * acc[:, :, b:b + W]
        return out

    x1 = img1.reshape(N * C, H, W)
    x2 = img2.reshape(N * C, H, W)
    mu1, mu2 = conv(x1), conv(x2)
    mu1_sq, mu2_sq, mu1_mu2 = mu1 * mu1, mu2 * mu2, mu1 * mu2
    s1 = conv(x1 * x1) - mu1_sq
    s2 = conv(x2 * x2) - mu2_sq
    s12 = conv(x1 * x2) - mu1_mu2
    ssim_map = ((2 * mu1_mu2 + _C1) * (2 * s12 + _C2)) / (
        (mu1_sq + mu2_sq + _C1) * (s1 + s2 + _C2)
    )
    ssim_map = ssim_map.reshape(N, C, H, W)
    if size_average:
        return ssim_map.mean()
    return ssim_map.mean(axis=(1, 2, 3))


if __name__ == "__main__":
    key = jax.random.PRNGKey(0)
    k1, k2 = jax.random.split(key)
    B, C, H, W = 2, 4, 16, 16
    img1 = jax.random.uniform(k1, (B, C, H, W), dtype=jnp.float32)
    img2 = jax.random.uniform(k2, (B, C, H, W), dtype=jnp.float32)

    loss = jax.block_until_ready(ssim_loss(img1, img2))
    assert loss.shape == () and bool(jnp.isfinite(loss))

    # Cross-check against an independent NumPy reference.
    ref = _ref_ssim(np.asarray(img1), np.asarray(img2))
    assert abs(float(loss) - float(ref)) < 2e-3, (float(loss), float(ref))

    # SSIM of an image with itself is exactly 1.
    self_loss = jax.block_until_ready(ssim_loss(img1, img1))
    assert abs(float(self_loss) - 1.0) < 1e-5

    # size_average=False branch (per-batch-item mean).
    per_item = jax.block_until_ready(ssim_loss(img1, img2, size_average=False))
    assert per_item.shape == (B,)
    ref_items = _ref_ssim(np.asarray(img1), np.asarray(img2), size_average=False)
    assert float(np.max(np.abs(np.asarray(per_item) - ref_items))) < 2e-3

    print("KERNEL_OK")
</pallas_src>

<mosaic_0001>
module attributes {stable_mosaic.version = 11 : i64} {
  func.func @_ssim_block_kernel(%arg0: i32, %arg1: memref<16x16xf32, #tpu.memory_space<vmem>>, %arg2: memref<16x16xf32, #tpu.memory_space<vmem>>, %arg3: memref<4x16x16xf32, #tpu.memory_space<vmem>>, %arg4: memref<4x16x16xf32, #tpu.memory_space<vmem>>, %arg5: memref<4x1x1xf32, #tpu.memory_space<vmem>>) attributes {dimension_semantics = [#tpu.dimension_semantics<parallel>], iteration_bounds = array<i64: 2>, scalar_prefetch = 0 : i64, scratch_operands = 0 : i64, tpu.core_type = #tpu.core_type<tc>, window_params = [{pipeline_mode = #tpu.pipeline_mode<synchronous>, transform_indices = @transform_0, window_bounds = array<i64: 16, 16>}, {pipeline_mode = #tpu.pipeline_mode<synchronous>, transform_indices = @transform_1, window_bounds = array<i64: 16, 16>}, {transform_indices = @transform_2, window_bounds = array<i64: 4, 16, 16>}, {transform_indices = @transform_3, window_bounds = array<i64: 4, 16, 16>}, {transform_indices = @transform_4, window_bounds = array<i64: 4, 1, 1>}]} {
    %c0 = arith.constant 0 : index
    %c0_0 = arith.constant 0 : index
    %c0_1 = arith.constant 0 : index
    %0 = vector.load %arg3[%c0, %c0_0, %c0_1] : memref<4x16x16xf32, #tpu.memory_space<vmem>>, vector<4x16x16xf32>
    %1 = vector.shape_cast %0 : vector<4x16x16xf32> to vector<64x16xf32>
    %c0_2 = arith.constant 0 : index
    %c0_3 = arith.constant 0 : index
    %c0_4 = arith.constant 0 : index
    %2 = vector.load %arg4[%c0_2, %c0_3, %c0_4] : memref<4x16x16xf32, #tpu.memory_space<vmem>>, vector<4x16x16xf32>
    %3 = vector.shape_cast %2 : vector<4x16x16xf32> to vector<64x16xf32>
    %4 = arith.mulf %1, %1 : vector<64x16xf32>
    %5 = arith.mulf %3, %3 : vector<64x16xf32>
    %6 = arith.mulf %1, %3 : vector<64x16xf32>
    %7 = tpu.concatenate %1, %3, %4, %5, %6 in 0 : vector<64x16xf32>, vector<64x16xf32>, vector<64x16xf32>, vector<64x16xf32>, vector<64x16xf32> -> vector<320x16xf32>
    %c0_5 = arith.constant 0 : index
    %c0_6 = arith.constant 0 : index
    %8 = vector.load %arg2[%c0_5, %c0_6] : memref<16x16xf32, #tpu.memory_space<vmem>>, vector<16x16xf32>
    %cst = arith.constant dense<0.000000e+00> : vector<320x16xf32>
    %9 = tpu.matmul %7, %8, %cst {dimension_numbers = #tpu.dot_dimension_numbers<[1], [0], [0], [1], [0, 0, 1, 1], [], []>} : vector<320x16xf32>, vector<16x16xf32>, vector<320x16xf32> -> vector<320x16xf32>
    %10 = vector.shape_cast %9 : vector<320x16xf32> to vector<20x16x16xf32>
    %11 = tpu.transpose %10, [0, 2, 1] : vector<20x16x16xf32> -> vector<20x16x16xf32>
    %12 = vector.shape_cast %11 : vector<20x16x16xf32> to vector<320x16xf32>
    %c0_7 = arith.constant 0 : index
    %c0_8 = arith.constant 0 : index
    %13 = vector.load %arg1[%c0_7, %c0_8] : memref<16x16xf32, #tpu.memory_space<vmem>>, vector<16x16xf32>
    %cst_9 = arith.constant dense<0.000000e+00> : vector<320x16xf32>
    %14 = tpu.matmul %12, %13, %cst_9 {dimension_numbers = #tpu.dot_dimension_numbers<[1], [0], [0], [1], [0, 0, 1, 1], [], []>} : vector<320x16xf32>, vector<16x16xf32>, vector<320x16xf32> -> vector<320x16xf32>
    %15 = vector.shape_cast %14 : vector<320x16xf32> to vector<20x16x16xf32>
    %16 = vector.extract_strided_slice %15 {offsets = [0, 0, 0], sizes = [4, 16, 16], strides = [1, 1, 1]} : vector<20x16x16xf32> to vector<4x16x16xf32>
    %17 = vector.extract_strided_slice %15 {offsets = [4, 0, 0], sizes = [4, 16, 16], strides = [1, 1, 1]} : vector<20x16x16xf32> to vector<4x16x16xf32>
    %18 = arith.mulf %16, %17 : vector<4x16x16xf32>
    %19 = arith.mulf %16, %16 : vector<4x16x16xf32>
    %20 = arith.mulf %17, %17 : vector<4x16x16xf32>
    %21 = arith.addf %19, %20 : vector<4x16x16xf32>
    %cst_10 = arith.constant 2.000000e+00 : f32
    %22 = vector.broadcast %cst_10 : f32 to vector<4x16x16xf32>
    %23 = arith.mulf %22, %18 : vector<4x16x16xf32>
    %cst_11 = arith.constant 9.99999974E-5 : f32
    %24 = vector.broadcast %cst_11 : f32 to vector<4x16x16xf32>
    %25 = arith.addf %23, %24 : vector<4x16x16xf32>
    %26 = vector.extract_strided_slice %15 {offsets = [16, 0, 0], sizes = [4, 16, 16], strides = [1, 1, 1]} : vector<20x16x16xf32> to vector<4x16x16xf32>
    %27 = arith.subf %26, %18 : vector<4x16x16xf32>
    %cst_12 = arith.constant 2.000000e+00 : f32
    %28 = vector.broadcast %cst_12 : f32 to vector<4x16x16xf32>
    %29 = arith.mulf %28, %27 : vector<4x16x16xf32>
    %cst_13 = arith.constant 8.99999984E-4 : f32
    %30 = vector.broadcast %cst_13 : f32 to vector<4x16x16xf32>
    %31 = arith.addf %29, %30 : vector<4x16x16xf32>
    %32 = arith.mulf %25, %31 : vector<4x16x16xf32>
    %cst_14 = arith.constant 9.99999974E-5 : f32
    %33 = vector.broadcast %cst_14 : f32 to vector<4x16x16xf32>
    %34 = arith.addf %21, %33 : vector<4x16x16xf32>
    %35 = vector.extract_strided_slice %15 {offsets = [8, 0, 0], sizes = [4, 16, 16], strides = [1, 1, 1]} : vector<20x16x16xf32> to vector<4x16x16xf32>
    %36 = vector.extract_strided_slice %15 {offsets = [12, 0, 0], sizes = [4, 16, 16], strides = [1, 1, 1]} : vector<20x16x16xf32> to vector<4x16x16xf32>
    %37 = arith.addf %35, %36 : vector<4x16x16xf32>
    %38 = arith.subf %37, %21 : vector<4x16x16xf32>
    %cst_15 = arith.constant 8.99999984E-4 : f32
    %39 = vector.broadcast %cst_15 : f32 to vector<4x16x16xf32>
    %40 = arith.addf %38, %39 : vector<4x16x16xf32>
    %41 = arith.mulf %34, %40 : vector<4x16x16xf32>
    %42 = tpu.reciprocal %41 {approx = true} : vector<4x16x16xf32> -> vector<4x16x16xf32>
    %43 = arith.mulf %41, %42 : vector<4x16x16xf32>
    %cst_16 = arith.constant 2.000000e+00 : f32
    %44 = vector.broadcast %cst_16 : f32 to vector<4x16x16xf32>
    %45 = arith.subf %44, %43 : vector<4x16x16xf32>
    %46 = arith.mulf %42, %45 : vector<4x16x16xf32>
    %47 = arith.mulf %32, %46 : vector<4x16x16xf32>
    %cst_17 = arith.constant dense<0.000000e+00> : vector<4x16xf32>
    %48 = vector.multi_reduction <add>, %47, %cst_17 [2] : vector<4x16x16xf32> to vector<4x16xf32>
    %49 = vector.shape_cast %48 : vector<4x16xf32> to vector<4x16x1xf32>
    %cst_18 = arith.constant dense<0.000000e+00> : vector<4x1xf32>
    %50 = vector.multi_reduction <add>, %49, %cst_18 [1] : vector<4x16x1xf32> to vector<4x1xf32>
    %51 = vector.shape_cast %50 : vector<4x1xf32> to vector<4x1x1xf32>
    %c0_19 = arith.constant 0 : index
    %c0_20 = arith.constant 0 : index
    %c0_21 = arith.constant 0 : index
    %52 = vector.load %arg5[%c0_19, %c0_20, %c0_21] : memref<4x1x1xf32, #tpu.memory_space<vmem>>, vector<4x1x1xf32>
    tpu.vector_store %arg5[%c0_19, %c0_20, %c0_21], %51 {strides = array<i32>} : memref<4x1x1xf32, #tpu.memory_space<vmem>>, vector<4x1x1xf32>,
    return
  }
  func.func @transform_0(%arg0: i32) -> (i32, i32) {
    %c0_i32 = arith.constant 0 : i32
    %c0_i32_0 = arith.constant 0 : i32
    %c0_i32_1 = arith.constant 0 : i32
    return %c0_i32, %c0_i32_0 : i32, i32
  }
  func.func @transform_1(%arg0: i32) -> (i32, i32) {
    %c0_i32 = arith.constant 0 : i32
    %c0_i32_0 = arith.constant 0 : i32
    %c0_i32_1 = arith.constant 0 : i32
    return %c0_i32, %c0_i32_0 : i32, i32
  }
  func.func @transform_2(%arg0: i32) -> (i32, i32, i32) {
    %c0_i32 = arith.constant 0 : i32
    %c0_i32_0 = arith.constant 0 : i32
    %c0_i32_1 = arith.constant 0 : i32
    return %arg0, %c0_i32, %c0_i32_0 : i32, i32, i32
  }
  func.func @transform_3(%arg0: i32) -> (i32, i32, i32) {
    %c0_i32 = arith.constant 0 : i32
    %c0_i32_0 = arith.constant 0 : i32
    %c0_i32_1 = arith.constant 0 : i32
    return %arg0, %c0_i32, %c0_i32_0 : i32, i32, i32
  }
  func.func @transform_4(%arg0: i32) -> (i32, i32, i32) {
    %c0_i32 = arith.constant 0 : i32
    %c0_i32_0 = arith.constant 0 : i32
    %c0_i32_1 = arith.constant 0 : i32
    return %arg0, %c0_i32, %c0_i32_0 : i32, i32, i32
  }
}

</mosaic_0001>

<bundles_post_ra>
// kernel: tpu_custom_call.1
= control target key start
LH: loop header
LB: loop body
LE: loop exit
PB: predicated region body
PF: predicated region fallthrough
CT: control target
= control target key end

     0   :  { %9 = vsyncpa [#allocation3], 0  ;;  %s3090_s0 = inlined_call_operand.hbm [shape: f32[16,16], index: 0, kind: input, shape index: {}]   ;;  %s3091_s1 = inlined_call_operand.hbm [shape: f32[16,16], index: 1, kind: input, shape index: {}]   ;;  %s3092_s2 = inlined_call_operand.hbm [shape: f32[8,16,16], index: 2, kind: input, shape index: {}]   ;;  %s3093_s3 = inlined_call_operand.hbm [shape: f32[8,16,16], index: 3, kind: input, shape index: {}]   ;;  %s3094_s4 = inlined_call_operand.vmem [shape: f32[8,1,1], index: 4, kind: output, shape index: {}]  }
   0x1   :  { %10 = vsyncpa [#allocation5], 0  ;;  %s2666_s15 = smov 0   ;;  %s2668_s16 = smov 0  }
   0x2   :  { %s2670_s17 = smov 0   ;;  %s2672_s18 = smov 0  }
   0x3 LB: > { %s2685_s19 = sadd.s32 4294967295, %s2633_s18   ;;  %s2688_s20 = sadd.s32 1, %s2633_s18   ;;  %s2633_s18 = sphi %s2672_s18, %s3122_s18   ;;  %s2629_s17 = sphi %s2670_s17, %s3121_s17   ;;  %s2625_s16 = sphi %s2668_s16, %s3120_s16   ;;  %s2621_s15 = sphi %s2666_s15, %s3119_s15  }
   0x4   : > { %s62_s21 = ssub.s32 %s2633_s18, %s2688_s20  ;;  %s65_s22 = sadd.s32 1, %s2629_s17 }
   0x5   : > { %p63_p0 = scmp.eq.s32.totalorder %s62_s21, 0  ;;  %p72_p1 = scmp.ne.s32.totalorder %s2629_s17, %s2625_s16 }
   0x6   : > { %p73_p2 = scmp.eq.s32.totalorder %s2633_s18, 0  ;;  %p78_p3 = scmp.ne.s32.totalorder %s2625_s16, %s2621_s15 }
   0x7   : > { %s2698_s23 = scalar_select %p63_p0, %s2629_s17, %s65_s22  }
   0x8   : > { %p2700_p4 = por %p73_p2, %p72_p1  ;;  %p3095_p5 = scmp.eq.s32.totalorder %s2685_s19, 0 }
   0x9   : > { %p2059_p6 = scmp.ge.s32.totalorder %s2633_s18, 1  ;;  %p141_p7 = scmp.lt.s32.totalorder %s2633_s18, 3 }
   0xa   : > { %p2709_p8 = por %p3095_p5, %p78_p3  ;;  %s2635_s27 = smov [#allocation2]  }
   0xb   : > { %p2713_p9 = pnand %p2059_p6, %p141_p7  ;;  %s153_s28 = sshll.u32 %s2635_s27, 4  ;;  %s154_s28 = int_to_ptr.vmem [resolvable:$true] %s153_s28 }
   0xc   : > { %s3103_s25 = scalar_select %p2709_p8, 1, 0 }
   0xd   : > { %s3104_s26 = scalar_select %p2713_p9, 1, 0 }
   0xe   : > { %p2403_p10 = pneg %p2713_p9  ;;  %p2419_p12 = scmp.lt.s32.totalorder %s2633_s18, 2 }
   0xf   : > { %s180_s30 = sand.u32 1, %s2633_s18   ;;  %s182_s5 = sand.u32 1, %s2629_s17  }
  0x10   : > { %p2721_p11 = pnand %p2403_p10, %p3095_p5  ;;  %p2730_p13 = pnand %p2419_p12, %p2700_p4 }
  0x11   : > { %s2475_s9 = scalar_lea.hbm %s3090_s0, 256 }
  0x12   : > { %s3106_s6 = scalar_select %p2730_p13, 1, 0 }
  0x13   : > { %p2476_p0 = scmp.ne.s32.totalorder %s3090_s0, %s2475_s9  ;;  %p3099_p1 = pneg %p2721_p11 }
  0x14   : > { %p2482_p4 = scmp.lt.u32.totalorder %s2475_s9, %s3090_s0 }
  0x15   : > { %p2478_p2 = pnand %p3099_p1, %p2476_p0 }
  0x17   : > { %p2479_p3 = pneg %p2478_p2 }
  0x19   : > { %p2484_p6 = pnand %p2482_p4, %p2479_p3 }
  0x1b   : > { %2487 = shalt.err (!%p2484_p6)
}
  0x1c   : > { %s2488_s14 = scalar_lea.vmem %s154_s28, 256  ;;  %p2496_p5 = scmp.lt.s32.totalorder %s154_s28, %s154_s28 }
  0x1d   : > { %p2489_p7 = scmp.ne.s32.totalorder %s154_s28, %s2488_s14  ;;  %p2497_p8 = scmp.lt.s32.totalorder %s2488_s14, %s2488_s14 }
  0x1f   : > { %p2491_p10 = pnand %p2489_p7, %p3099_p1  ;;  %p2498_p9 = por %p2497_p8, %p2496_p5 }
  0x21   : > { %p2492_p12 = pneg %p2491_p10 }
  0x23   : > { %p2499_p13 = pnand %p2498_p9, %p2492_p12 }
  0x25   : > { %2502 = shalt.err (!%p2499_p13)
}
  0x26   : > { %s2636_s15 = smov 128   ;;  %s2637_s21 = smov 8  }
  0x27   : > { %2406 = dma.hbm_to_vmem [thread:$0]  (!%p2721_p11), %s3090_s0, 256, %s154_s28, [#allocation3], %s2636_s15, %s2636_s15, %s2637_s21  }
  0x28   : > { %s2759_s27 = sshll.u32 %s182_s5, 6  ;;  %s2160_s7 = sshll.u32 %s2633_s18, 10 }
  0x29   : > { %s2767_s10 = scalar_lea.hbm %s3092_s2, %s2160_s7  ;;  %s184_s11 = scalar_lea.vmem [#allocation6], %s2759_s27 }
  0x2a   : > { %s192_s12 = sshll.u32 %s184_s11, 4  ;;  %s2638_s13 = smov [#allocation4]   ;;  %s2770_s12 = int_to_ptr.vmem [resolvable:$true] %s192_s12 }
  0x2b   : > { %s2772_s28 = sshll.u32 %s2638_s13, 4  ;;  %s2776_s5 = scalar_lea.sflag [#allocation3], %s180_s30  ;;  %s167_s28 = int_to_ptr.vmem [resolvable:$true] %s2772_s28 }
  0x2c   : > { %s2503_s14 = scalar_lea.hbm %s2767_s10, 1024  ;;  %p3107_p8 = scmp.ne.s32.totalorder %s3106_s6, 0 }
  0x2d   : > { %p2504_p5 = scmp.ne.s32.totalorder %s2767_s10, %s2503_s14  ;;  %s2508_s8 = scalar_lea.hbm %s3092_s2, 2048 }
  0x2e   : > { %p3100_p9 = pneg %p3107_p8  ;;  %p2509_p2 = scmp.lt.u32.totalorder %s2767_s10, %s3092_s2 }
  0x2f   : > { %p2510_p3 = scmp.lt.u32.totalorder %s2508_s8, %s2503_s14  ;;  %p2512_p6 = scmp.lt.u32.totalorder %s2503_s14, %s2767_s10 }
  0x30   : > { %p2506_p13 = pnand %p3100_p9, %p2504_p5 }
  0x31   : > { %p2511_p4 = por %p2510_p3, %p2509_p2 }
  0x32   : > { %p2507_p0 = pneg %p2506_p13 }
  0x33   : > { %p2513_p7 = por %p2512_p6, %p2511_p4 }
  0x35   : > { %p2514_p10 = pnand %p2513_p7, %p2507_p0 }
  0x37   : > { %2517 = shalt.err (!%p2514_p10)
}
  0x38   : > { %s2518_s30 = scalar_lea.vmem %s2770_s12, 1024  ;;  %s2639_s13 = smov [#allocation6]  }
  0x39   : > { %p2519_p12 = scmp.ne.s32.totalorder %s2770_s12, %s2518_s30  ;;  %s2523_s22 = sshll.u32 %s2639_s13, 4  ;;  %s2524_s22 = int_to_ptr.vmem [resolvable:$false] %s2523_s22 }
  0x3a   : > { %s2525_s24 = scalar_lea.vmem %s2524_s22, 2048  ;;  %p2526_p1 = scmp.lt.s32.totalorder %s2770_s12, %s2524_s22 }
  0x3b   : > { %p2521_p5 = pnand %p2519_p12, %p3100_p9  ;;  %p2527_p2 = scmp.lt.s32.totalorder %s2525_s24, %s2518_s30 }
  0x3d   : > { %p2522_p13 = pneg %p2521_p5  ;;  %p2528_p3 = por %p2527_p2, %p2526_p1 }
  0x3f   : > { %p2529_p4 = pnand %p2528_p3, %p2522_p13 }
  0x41   : > { %2532 = shalt.err (!%p2529_p4)
}
  0x42   : > { %2413 = dma.hbm_to_vmem [thread:$0]  (!%p3107_p8), %s2767_s10, 1024, %s2770_s12, %s2776_s5, %s2636_s15, %s2636_s15, %s2637_s21  }
  0x43   : > { %s2533_s9 = scalar_lea.hbm %s3091_s1, 256  ;;  %p3108_p0 = pneg %p2721_p11 }
  0x44   : > { %p2534_p1 = scmp.ne.s32.totalorder %s3091_s1, %s2533_s9  ;;  %p2540_p10 = scmp.lt.u32.totalorder %s2533_s9, %s3091_s1 }
  0x46   : > { %p2536_p6 = pnand %p2534_p1, %p3108_p0 }
  0x48   : > { %p2537_p7 = pneg %p2536_p6 }
  0x4a   : > { %p2542_p12 = pnand %p2540_p10, %p2537_p7 }
  0x4c   : > { %2545 = shalt.err (!%p2542_p12)
}
  0x4d   : > { %s2546_s10 = scalar_lea.vmem %s167_s28, 256  ;;  %p3109_p13 = pmov %p3108_p0 }
  0x4e   : > { %p2547_p5 = scmp.ne.s32.totalorder %s167_s28, %s2546_s10  ;;  %p2554_p4 = scmp.lt.s32.totalorder %s167_s28, %s167_s28 }
  0x4f   : > { %p2555_p9 = scmp.lt.s32.totalorder %s2546_s10, %s2546_s10 }
  0x50   : > { %p2549_p2 = pnand %p2547_p5, %p3109_p13 }
  0x51   : > { %p2556_p8 = por %p2555_p9, %p2554_p4 }
  0x52   : > { %p2550_p3 = pneg %p2549_p2 }
  0x54   : > { %p2557_p0 = pnand %p2556_p8, %p2550_p3 }
  0x56   : > { %2560 = shalt.err (!%p2557_p0)
}
  0x57   : > { %2409 = dma.hbm_to_vmem [thread:$0]  (!%p2721_p11), %s3091_s1, 256, %s167_s28, [#allocation5], %s2636_s15, %s2636_s15, %s2637_s21  }
  0x58   : > { %s2836_s9 = scalar_lea.hbm %s3093_s3, %s2160_s7  ;;  %s206_s29 = scalar_lea.vmem [#allocation7], %s2759_s27 }
  0x59   : > { %s214_s11 = sshll.u32 %s206_s29, 4  ;;  %s2561_s30 = scalar_lea.hbm %s2836_s9, 1024  ;;  %s2839_s11 = int_to_ptr.vmem [resolvable:$true] %s214_s11 }
  0x5a   : > { %p2562_p8 = scmp.ne.s32.totalorder %s2836_s9, %s2561_s30  ;;  %p3110_p9 = scmp.ne.s32.totalorder %s3106_s6, 0 }
  0x5b   : > { %s2566_s13 = scalar_lea.hbm %s3093_s3, 2048  ;;  %p2567_p7 = scmp.lt.u32.totalorder %s2836_s9, %s3093_s3 }
  0x5c   : > { %p3111_p1 = pneg %p3110_p9  ;;  %p2568_p10 = scmp.lt.u32.totalorder %s2566_s13, %s2561_s30 }
  0x5d   : > { %p2570_p5 = scmp.lt.u32.totalorder %s2561_s30, %s2836_s9 }
  0x5e   : > { %p2564_p6 = pnand %p2562_p8, %p3111_p1  ;;  %p2569_p12 = por %p2568_p10, %p2567_p7 }
  0x60   : > { %p2565_p11 = pneg %p2564_p6  ;;  %p2571_p13 = por %p2570_p5, %p2569_p12 }
  0x62   : > { %p2572_p2 = pnand %p2571_p13, %p2565_p11 }
  0x64   : > { %2575 = shalt.err (!%p2572_p2)
}
  0x65   : > { %s2576_s27 = scalar_lea.vmem %s2839_s11, 1024  ;;  %p3112_p4 = pmov %p3111_p1 }
  0x66   : > { %p2577_p3 = scmp.ne.s32.totalorder %s2839_s11, %s2576_s27  ;;  %s2640_s10 = smov [#allocation7]  }
  0x67   : > { %s2581_s12 = sshll.u32 %s2640_s10, 4  ;;  %s2582_s12 = int_to_ptr.vmem [resolvable:$false] %s2581_s12 }
  0x68   : > { %p2579_p0 = pnand %p2577_p3, %p3112_p4  ;;  %s2583_s24 = scalar_lea.vmem %s2582_s12, 2048 }
  0x69   : > { %p2584_p1 = scmp.lt.s32.totalorder %s2839_s11, %s2582_s12  ;;  %p2585_p6 = scmp.lt.s32.totalorder %s2583_s24, %s2576_s27 }
  0x6a   : > { %p2580_p8 = pneg %p2579_p0 }
  0x6b   : > { %p2586_p7 = por %p2585_p6, %p2584_p1 }
  0x6d   : > { %p2587_p10 = pnand %p2586_p7, %p2580_p8 }
  0x6f   : > { %2590 = shalt.err (!%p2587_p10)
}
  0x70   : > { %2416 = dma.hbm_to_vmem [thread:$0]  (!%p3110_p9), %s2836_s9, 1024, %s2839_s11, %s2776_s5, %s2636_s15, %s2636_s15, %s2637_s21  }
  0x71   : > { %p3113_p11 = scmp.ne.s32.totalorder %s3104_s26, 0 }
  0x72   : > { %p3114_p12 = scmp.eq.s32.totalorder (!%p3113_p11), %s2685_s19, 0 }
  0x73   : > { %226 = sbr.rel (%p3113_p11) target bundleno = 947 (0x3b3), region = 36 }
  0x7a   : > { %2608 = dma.done.wait (%p3114_p12), [#allocation3], 256   ;;  %p3115_p5 = pmov %p3114_p12 }
  0x7c   : > { %2610 = vsyncadd (%p3115_p5), [#allocation3], 4294967040  ;;  %p3116_p13 = pmov %p3115_p5 }
  0x7d   : > { %p3117_p2 = pmov %p3115_p5 }
  0x7e   : > { %2612 = dma.done.wait (%p3116_p13), [#allocation5], 256  }
  0x7f   : > { %2614 = vsyncadd (%p3117_p2), [#allocation5], 4294967040  ;;  %s236_s6 = sand.u32 1, %s2685_s19   ;;  %s238_s15 = sand.u32 1, %s2625_s16  }
  0x80   : > { %s2074_s21 = sshll.u32 %s238_s15, 6  ;;  %s237_s26 = scalar_lea.sflag [#allocation3], %s236_s6 }
  0x81   : > { %s240_s5 = scalar_lea.vmem [#allocation6], %s2074_s21  ;;  %p3118_p9 = scmp.ne.s32.totalorder %s3103_s25, 0 }
  0x83   : > { %2616 = dma.done.wait (%p3118_p9), %s237_s26, 2048  }
  0x84   : > { %2618 = vsyncadd (%p3118_p9), %s237_s26, 4294965248  ;;  %vm327_vm0 = vcmask 130048   ;;  %v325_v0 = vld [vmem:[#allocation4] sm:$0xff]  ;;  %v326_v1 = vld [vmem:[#allocation4 + $0x8] sm:$0xff]  ;;  %s249_s25 = scalar_lea.vmem [#allocation7], %s2074_s21  ;;  %s2076_s14 = sshll.u32 %s2685_s19, 2 }
  0x85   : > { %v2884_v2 = vld [vmem:[%s240_s5] sm:$0xff]  ;;  %v2375_v3 = vpack.c.bf16 %v326_v1, %v325_v0  ;;  %v2888_v4 = vld [vmem:[%s240_s5 + $0x8] sm:$0xff]  ;;  %v2890_v5 = vld [vmem:[%s240_s5 + $0x10] sm:$0xff]  ;;  %p281_p3 = scmp.lt.s32.totalorder %s2076_s14, 7  ;;  %vm1952_vm1 = vcmask 0  }
  0x86   : > { %2251 = vmatprep.mubr.msk.f32.mxu0 %vm327_vm0, %v2884_v2  ;;  %v2896_v6 = vld [vmem:[%s240_s5 + $0x18] sm:$0xff]  ;;  %v2898_v7 = vld [vmem:[%s240_s5 + $0x20] sm:$0xff]  ;;  %v2904_v8 = vld [vmem:[%s240_s5 + $0x28] sm:$0xff]  ;;  %v301_v18 = vmul.f32 %v2884_v2, %v2884_v2  ;;  %v302_v20 = vmul.f32 %v2888_v4, %v2888_v4  ;;  %v303_v21 = vmul.f32 %v2890_v5, %v2890_v5 }
  0x87   : > { %2376 = vmatprep.subr.bf16.mxu0 %v2375_v3  ;;  %v2906_v9 = vld [vmem:[%s240_s5 + $0x30] sm:$0xff]  ;;  %v2912_v10 = vld [vmem:[%s240_s5 + $0x38] sm:$0xff]  ;;  %v293_v11 = vld [vmem:[%s249_s25] sm:$0xff]  ;;  %v304_v22 = vmul.f32 %v2896_v6, %v2896_v6  ;;  %v305_v23 = vmul.f32 %v2898_v7, %v2898_v7  ;;  %v306_v24 = vmul.f32 %v2904_v8, %v2904_v8  ;;  %s3124_s14 = smov (!%p281_p3, %s2076_s14), 7 }
  0x88   : > { %2378 = vmatpush3.bf16.msra.mxu0 %v2375_v3  ;;  %v294_v12 = vld [vmem:[%s249_s25 + $0x8] sm:$0xff]  ;;  %v295_v13 = vld [vmem:[%s249_s25 + $0x10] sm:$0xff]  ;;  %v296_v14 = vld [vmem:[%s249_s25 + $0x18] sm:$0xff]  ;;  %v307_v25 = vmul.f32 %v2906_v9, %v2906_v9  ;;  %v308_v26 = vmul.f32 %v2912_v10, %v2912_v10  ;;  %v309_v27 = vmul.f32 %v293_v11, %v293_v11  ;;  %v317_v35 = vmul.f32 %v293_v11, %v2884_v2  ;;  %s283_s29 = scalar_lea.vmem %s3094_s4, %s3124_s14 }
  0x89   : > { %v297_v15 = vld [vmem:[%s249_s25 + $0x20] sm:$0xff]  ;;  %v298_v16 = vld [vmem:[%s249_s25 + $0x28] sm:$0xff]  ;;  %v299_v17 = vld [vmem:[%s249_s25 + $0x30] sm:$0xff]  ;;  %v310_v28 = vmul.f32 %v294_v12, %v294_v12  ;;  %v311_v29 = vmul.f32 %v295_v13, %v295_v13  ;;  %v312_v30 = vmul.f32 %v296_v14, %v296_v14  ;;  %v318_v36 = vmul.f32 %v294_v12, %v2888_v4 }
  0x8a   : > { %v300_v19 = vld [vmem:[%s249_s25 + $0x38] sm:$0xff]  ;;  %v313_v31 = vmul.f32 %v297_v15, %v297_v15  ;;  %v314_v32 = vmul.f32 %v298_v16, %v298_v16  ;;  %v315_v33 = vmul.f32 %v299_v17, %v299_v17  ;;  %v319_v37 = vmul.f32 %v295_v13, %v2890_v5  ;;  %v1353_v44 = vld [vmem:[#allocation2] sm:$0xff]  ;;  %v1354_v45 = vld [vmem:[#allocation2 + $0x8] sm:$0xff] }
  0x8b   : > { %2252 = vmatmul.mubr.msk.f32.vlgmr.msra.gmra.mrb[0].mxu0 %vm327_vm0, %v2888_v4  ;;  %v316_v34 = vmul.f32 %v300_v19, %v300_v19  ;;  %v320_v38 = vmul.f32 %v296_v14, %v2896_v6  ;;  %v321_v39 = vmul.f32 %v297_v15, %v2898_v7  ;;  %v322_v40 = vmul.f32 %v298_v16, %v2904_v8 }
  0x8c   : > { %2254 = vmatprep.mubr.msk.f32.mxu0 %vm327_vm0, %v2890_v5  ;;  %v323_v41 = vmul.f32 %v299_v17, %v2906_v9  ;;  %v324_v42 = vmul.f32 %v300_v19, %v2912_v10  ;;  %v2379_v47 = vpack.c.bf16 %v1354_v45, %v1353_v44 }
  0x8e   : > { %2380 = vmatprep.subr.bf16.mxu1 %v2379_v47 }
  0x8f   : > { %2255 = vmatmul.mubr.msk.f32.gmra.mrb[2].mxu0 %vm327_vm0, %v2896_v6  ;;  %2382 = vmatpush3.bf16.msra.mxu1 %v2379_v47 }
  0x90   : > { %2257 = vmatprep.mubr.msk.f32.mxu0 %vm327_vm0, %v2898_v7 }
  0x93   : > { %2258 = vmatmul.mubr.msk.f32.gmra.mrb[4].mxu0 %vm327_vm0, %v2904_v8 }
  0x94   : > { %2260 = vmatprep.mubr.msk.f32.mxu0 %vm327_vm0, %v2906_v9 }
  0x97   : > { %2261 = vmatmul.mubr.msk.f32.gmra.mrb[6].mxu0 %vm327_vm0, %v2912_v10 }
  0x98   : > { %2263 = vmatprep.mubr.msk.f32.mxu0 %vm327_vm0, %v293_v11 }
  0x9b   : > { %2264 = vmatmul.mubr.msk.f32.gmra.mrb[8].mxu0 %vm327_vm0, %v294_v12 }
  0x9c   : > { %2266 = vmatprep.mubr.msk.f32.mxu0 %vm327_vm0, %v295_v13 }
  0x9f   : > { %2267 = vmatmul.mubr.msk.f32.gmra.mrb[10].mxu0 %vm327_vm0, %v296_v14 }
  0xa0   : > { %2269 = vmatprep.mubr.msk.f32.mxu0 %vm327_vm0, %v297_v15 }
  0xa3   : > { %2270 = vmatmul.mubr.msk.f32.gmra.mrb[12].mxu0 %vm327_vm0, %v298_v16 }
  0xa4   : > { %2272 = vmatprep.mubr.msk.f32.mxu0 %vm327_vm0, %v299_v17 }
  0xa7   : > { %2273 = vmatmul.mubr.msk.f32.gmra.mrb[14].mxu0 %vm327_vm0, %v300_v19 }
  0xa8   : > { %2275 = vmatprep.mubr.msk.f32.mxu0 %vm327_vm0, %v301_v18 }
  0xab   : > { %2276 = vmatmul.mubr.msk.f32.gmra.mrb[16].mxu0 %vm327_vm0, %v302_v20 }
  0xac   : > { %2278 = vmatprep.mubr.msk.f32.mxu0 %vm327_vm0, %v303_v21 }
  0xaf   : > { %2279 = vmatmul.mubr.msk.f32.gmra.mrb[18].mxu0 %vm327_vm0, %v304_v22 }
  0xb0   : > { %2281 = vmatprep.mubr.msk.f32.mxu0 %vm327_vm0, %v305_v23 }
  0xb3   : > { %2282 = vmatmul.mubr.msk.f32.gmra.mrb[20].mxu0 %vm327_vm0, %v306_v24 }
  0xb4   : > { %2284 = vmatprep.mubr.msk.f32.mxu0 %vm327_vm0, %v307_v25 }
  0xb7   : > { %2285 = vmatmul.mubr.msk.f32.gmra.mrb[22].mxu0 %vm327_vm0, %v308_v26 }
  0xb8   : > { %2287 = vmatprep.mubr.msk.f32.mxu0 %vm327_vm0, %v309_v27 }
  0xbb   : > { %2288 = vmatmul.mubr.msk.f32.gmra.mrb[24].mxu0 %vm327_vm0, %v310_v28 }
  0xbc   : > { %2290 = vmatprep.mubr.msk.f32.mxu0 %vm327_vm0, %v311_v29 }
  0xbf   : > { %2291 = vmatmul.mubr.msk.f32.gmra.mrb[26].mxu0 %vm327_vm0, %v312_v30 }
  0xc0   : > { %2293 = vmatprep.mubr.msk.f32.mxu0 %vm327_vm0, %v313_v31 }
  0xc3   : > { %2294 = vmatmul.mubr.msk.f32.gmra.mrb[28].mxu0 %vm327_vm0, %v314_v32 }
  0xc4   : > { %2296 = vmatprep.mubr.msk.f32.mxu0 %vm327_vm0, %v315_v33 }
  0xc7   : > { %2297 = vmatmul.mubr.msk.f32.gmra.mrb[30].mxu0 %vm327_vm0, %v316_v34 }
  0xc8   : > { %2299 = vmatprep.mubr.msk.f32.mxu0 %vm327_vm0, %v317_v35 }
  0xcb   : > { %2300 = vmatmul.mubr.msk.f32.gmra.mrb[32].mxu0 %vm327_vm0, %v318_v36 }
  0xcc   : > { %2302 = vmatprep.mubr.msk.f32.mxu0 %vm327_vm0, %v319_v37 }
  0xcf   : > { %2303 = vmatmul.mubr.msk.f32.gmra.mrb[34].mxu0 %vm327_vm0, %v320_v38 }
  0xd0   : > { %2305 = vmatprep.mubr.msk.f32.mxu0 %vm327_vm0, %v321_v39 }
  0xd3   : > { %2306 = vmatmul.mubr.msk.f32.gmra.mrb[36].mxu0 %vm327_vm0, %v322_v40 }
  0xd4   : > { %2308 = vmatprep.mubr.msk.f32.mxu0 %vm327_vm0, %v323_v41 }
  0xd7   : > { %2309 = vmatmul.mubr.msk.f32.gmra.mrb[38].mxu0 %vm327_vm0, %v324_v42 }
 0x15e   : > { %v2253_v43 = vpop.f32.mrb[0].mxu0 }
 0x15f   : > { %v514_v46 = vpop.f32.mrb[1].mxu0 }
 0x160   : > { %713 = vxpose.xlu0.b32.start [1/2] (short) (narrow) %v514_v46, 16 }
 0x162   : > { %v2256_v48 = vpop.f32.mrb[2].mxu0 }
 0x163   : > { %v524_v49 = vpop.f32.mrb[3].mxu0 }
 0x164   : > { %714 = vxpose.xlu0.b32.end [2/2] (short) (narrow) %v2253_v43, 16  ;;  %745 = vxpose.xlu1.b32.start [1/2] (short) (narrow) %v524_v49, 16 }
 0x166   : > { %v2259_v50 = vpop.f32.mrb[4].mxu0 }
 0x167   : > { %v534_v51 = vpop.f32.mrb[5].mxu0 }
 0x168   : > { %746 = vxpose.xlu1.b32.end [2/2] (short) (narrow) %v2256_v48, 16  ;;  %777 = vxpose.xlu0.b32.start [1/2] (short) (narrow) %v534_v51, 16 }
 0x16a   : > { %v2262_v52 = vpop.f32.mrb[6].mxu0 }
 0x16b   : > { %v544_v53 = vpop.f32.mrb[7].mxu0 }
 0x16c   : > { %778 = vxpose.xlu0.b32.end [2/2] (short) (narrow) %v2259_v50, 16  ;;  %809 = vxpose.xlu1.b32.start [1/2] (short) (narrow) %v544_v53, 16 }
 0x16e   : > { %v2265_v54 = vpop.f32.mrb[8].mxu0 }
 0x16f   : > { %v554_v55 = vpop.f32.mrb[9].mxu0 }
 0x170   : > { %810 = vxpose.xlu1.b32.end [2/2] (short) (narrow) %v2262_v52, 16  ;;  %841 = vxpose.xlu0.b32.start [1/2] (short) (narrow) %v554_v55, 16 }
 0x172   : > { %v2268_v56 = vpop.f32.mrb[10].mxu0 }
 0x173   : > { %v564_v57 = vpop.f32.mrb[11].mxu0 }
 0x174   : > { %842 = vxpose.xlu0.b32.end [2/2] (short) (narrow) %v2265_v54, 16  ;;  %873 = vxpose.xlu1.b32.start [1/2] (short) (narrow) %v564_v57, 16 }
 0x176   : > { %v2271_v58 = vpop.f32.mrb[12].mxu0 }
 0x177   : > { %v574_v59 = vpop.f32.mrb[13].mxu0 }
 0x178   : > { %874 = vxpose.xlu1.b32.end [2/2] (short) (narrow) %v2268_v56, 16  ;;  %905 = vxpose.xlu0.b32.start [1/2] (short) (narrow) %v574_v59, 16 }
 0x17a   : > { %v2274_v60 = vpop.f32.mrb[14].mxu0 }
 0x17b   : > { %v584_v61 = vpop.f32.mrb[15].mxu0 }
 0x17c   : > { %906 = vxpose.xlu0.b32.end [2/2] (short) (narrow) %v2271_v58, 16  ;;  %937 = vxpose.xlu1.b32.start [1/2] (short) (narrow) %v584_v61, 16 }
 0x17e   : > { %v2277_v62 = vpop.f32.mrb[16].mxu0 }
 0x17f   : > { %v594_v63 = vpop.f32.mrb[17].mxu0 }
 0x180   : > { %938 = vxpose.xlu1.b32.end [2/2] (short) (narrow) %v2274_v60, 16  ;;  %969 = vxpose.xlu0.b32.start [1/2] (short) (narrow) %v594_v63, 16 }
 0x182   : > { %v2280_v0 = vpop.f32.mrb[18].mxu0 }
 0x183   : > { %v604_v1 = vpop.f32.mrb[19].mxu0 }
 0x184   : > { %970 = vxpose.xlu0.b32.end [2/2] (short) (narrow) %v2277_v62, 16  ;;  %1001 = vxpose.xlu1.b32.start [1/2] (short) (narrow) %v604_v1, 16 }
 0x186   : > { %v2283_v2 = vpop.f32.mrb[20].mxu0 }
 0x187   : > { %v614_v3 = vpop.f32.mrb[21].mxu0 }
 0x188   : > { %1002 = vxpose.xlu1.b32.end [2/2] (short) (narrow) %v2280_v0, 16  ;;  %1033 = vxpose.xlu0.b32.start [1/2] (short) (narrow) %v614_v3, 16 }
 0x18a   : > { %v2286_v4 = vpop.f32.mrb[22].mxu0 }
 0x18b   : > { %v624_v5 = vpop.f32.mrb[23].mxu0 }
 0x18c   : > { %1034 = vxpose.xlu0.b32.end [2/2] (short) (narrow) %v2283_v2, 16  ;;  %1065 = vxpose.xlu1.b32.start [1/2] (short) (narrow) %v624_v5, 16 }
 0x18e   : > { %v2289_v6 = vpop.f32.mrb[24].mxu0 }
 0x18f   : > { %v634_v7 = vpop.f32.mrb[25].mxu0 }
 0x190   : > { %1066 = vxpose.xlu1.b32.end [2/2] (short) (narrow) %v2286_v4, 16  ;;  %1097 = vxpose.xlu0.b32.start [1/2] (short) (narrow) %v634_v7, 16 }
 0x192   : > { %v2292_v8 = vpop.f32.mrb[26].mxu0 }
 0x193   : > { %v644_v9 = vpop.f32.mrb[27].mxu0 }
 0x194   : > { %1098 = vxpose.xlu0.b32.end [2/2] (short) (narrow) %v2289_v6, 16  ;;  %1129 = vxpose.xlu1.b32.start [1/2] (short) (narrow) %v644_v9, 16 }
 0x196   : > { %v2295_v10 = vpop.f32.mrb[28].mxu0 }
 0x197   : > { %v654_v11 = vpop.f32.mrb[29].mxu0 }
 0x198   : > { %1130 = vxpose.xlu1.b32.end [2/2] (short) (narrow) %v2292_v8, 16  ;;  %1161 = vxpose.xlu0.b32.start [1/2] (short) (narrow) %v654_v11, 16 }
 0x19a   : > { %v2298_v12 = vpop.f32.mrb[30].mxu0 }
 0x19b   : > { %v664_v13 = vpop.f32.mrb[31].mxu0 }
 0x19c   : > { %1162 = vxpose.xlu0.b32.end [2/2] (short) (narrow) %v2295_v10, 16  ;;  %1193 = vxpose.xlu1.b32.start [1/2] (short) (narrow) %v664_v13, 16 }
 0x19e   : > { %v2301_v14 = vpop.f32.mrb[32].mxu0 }
 0x19f   : > { %v674_v15 = vpop.f32.mrb[33].mxu0 }
 0x1a0   : > { %1194 = vxpose.xlu1.b32.end [2/2] (short) (narrow) %v2298_v12, 16  ;;  %1225 = vxpose.xlu0.b32.start [1/2] (short) (narrow) %v674_v15, 16 }
 0x1a2   : > { %v2304_v16 = vpop.f32.mrb[34].mxu0 }
 0x1a3   : > { %v684_v17 = vpop.f32.mrb[35].mxu0 }
 0x1a4   : > { %1226 = vxpose.xlu0.b32.end [2/2] (short) (narrow) %v2301_v14, 16  ;;  %1257 = vxpose.xlu1.b32.start [1/2] (short) (narrow) %v684_v17, 16 }
 0x1a6   : > { %v2307_v18 = vpop.f32.mrb[36].mxu0 }
 0x1a7   : > { %v694_v19 = vpop.f32.mrb[37].mxu0 }
 0x1a8   : > { %1258 = vxpose.xlu1.b32.end [2/2] (short) (narrow) %v2304_v16, 16  ;;  %1289 = vxpose.xlu0.b32.start [1/2] (short) (narrow) %v694_v19, 16 }
 0x1aa   : > { %v2310_v20 = vpop.f32.mrb[38].mxu0 }
 0x1ab   : > { %v704_v21 = vpop.f32.mrb[39].mxu0 }
 0x1ac   : > { %1290 = vxpose.xlu0.b32.end [2/2] (short) (narrow) %v2307_v18, 16  ;;  %1321 = vxpose.xlu1.b32.start [1/2] (short) (narrow) %v704_v21, 16 }
 0x1b0   : > { %1322 = vxpose.xlu1.b32.end [2/2] (short) (narrow) %v2310_v20, 16 }
 0x1e0   : > { %v729_v22 = vpop.trf.xlu0 }
 0x1e1   : > { %2315 = vmatprep.mubr.msk.f32.mxu1 %vm327_vm0, %v729_v22 }
 0x1e4   : > { %v730_v23 = vpop.trf.xlu0  ;;  %v761_v24 = vpop.trf.xlu1 }
 0x1e5   : > { %2316 = vmatmul.mubr.msk.f32.vlgmr.msra.gmra.mrb[0].mxu1 %vm327_vm0, %v730_v23 }
 0x1e6   : > { %2318 = vmatprep.mubr.msk.f32.mxu1 %vm327_vm0, %v761_v24 }
 0x1e8   : > { %v762_v25 = vpop.trf.xlu1  ;;  %v793_v26 = vpop.trf.xlu0 }
 0x1e9   : > { %2319 = vmatmul.mubr.msk.f32.gmra.mrb[2].mxu1 %vm327_vm0, %v762_v25 }
 0x1ea   : > { %2321 = vmatprep.mubr.msk.f32.mxu1 %vm327_vm0, %v793_v26 }
 0x1ec   : > { %v794_v27 = vpop.trf.xlu0  ;;  %v825_v28 = vpop.trf.xlu1 }
 0x1ed   : > { %2322 = vmatmul.mubr.msk.f32.gmra.mrb[4].mxu1 %vm327_vm0, %v794_v27 }
 0x1ee   : > { %2324 = vmatprep.mubr.msk.f32.mxu1 %vm327_vm0, %v825_v28 }
 0x1f0   : > { %v826_v29 = vpop.trf.xlu1  ;;  %v857_v30 = vpop.trf.xlu0 }
 0x1f1   : > { %2325 = vmatmul.mubr.msk.f32.gmra.mrb[6].mxu1 %vm327_vm0, %v826_v29 }
 0x1f2   : > { %2327 = vmatprep.mubr.msk.f32.mxu1 %vm327_vm0, %v857_v30 }
 0x1f4   : > { %v858_v31 = vpop.trf.xlu0  ;;  %v889_v32 = vpop.trf.xlu1 }
 0x1f5   : > { %2328 = vmatmul.mubr.msk.f32.gmra.mrb[8].mxu1 %vm327_vm0, %v858_v31 }
 0x1f6   : > { %2330 = vmatprep.mubr.msk.f32.mxu1 %vm327_vm0, %v889_v32 }
 0x1f8   : > { %v890_v33 = vpop.trf.xlu1  ;;  %v921_v34 = vpop.trf.xlu0 }
 0x1f9   : > { %2331 = vmatmul.mubr.msk.f32.gmra.mrb[10].mxu1 %vm327_vm0, %v890_v33 }
 0x1fa   : > { %2333 = vmatprep.mubr.msk.f32.mxu1 %vm327_vm0, %v921_v34 }
 0x1fc   : > { %v922_v35 = vpop.trf.xlu0  ;;  %v953_v36 = vpop.trf.xlu1 }
 0x1fd   : > { %2334 = vmatmul.mubr.msk.f32.gmra.mrb[12].mxu1 %vm327_vm0, %v922_v35 }
 0x1fe   : > { %2336 = vmatprep.mubr.msk.f32.mxu1 %vm327_vm0, %v953_v36 }
 0x200   : > { %v954_v37 = vpop.trf.xlu1  ;;  %v985_v38 = vpop.trf.xlu0 }
 0x201   : > { %2337 = vmatmul.mubr.msk.f32.gmra.mrb[14].mxu1 %vm327_vm0, %v954_v37 }
 0x202   : > { %2339 = vmatprep.mubr.msk.f32.mxu1 %vm327_vm0, %v985_v38 }
 0x204   : > { %v986_v39 = vpop.trf.xlu0  ;;  %v1017_v40 = vpop.trf.xlu1 }
 0x205   : > { %2340 = vmatmul.mubr.msk.f32.gmra.mrb[16].mxu1 %vm327_vm0, %v986_v39 }
 0x206   : > { %2342 = vmatprep.mubr.msk.f32.mxu1 %vm327_vm0, %v1017_v40 }
 0x208   : > { %v1018_v41 = vpop.trf.xlu1  ;;  %v1049_v42 = vpop.trf.xlu0 }
 0x209   : > { %2343 = vmatmul.mubr.msk.f32.gmra.mrb[18].mxu1 %vm327_vm0, %v1018_v41 }
 0x20a   : > { %2345 = vmatprep.mubr.msk.f32.mxu1 %vm327_vm0, %v1049_v42 }
 0x20c   : > { %v1050_v43 = vpop.trf.xlu0  ;;  %v1081_v44 = vpop.trf.xlu1 }
 0x20d   : > { %2346 = vmatmul.mubr.msk.f32.gmra.mrb[20].mxu1 %vm327_vm0, %v1050_v43 }
 0x20e   : > { %2348 = vmatprep.mubr.msk.f32.mxu1 %vm327_vm0, %v1081_v44 }
 0x210   : > { %v1082_v45 = vpop.trf.xlu1  ;;  %v1113_v46 = vpop.trf.xlu0 }
 0x211   : > { %2349 = vmatmul.mubr.msk.f32.gmra.mrb[22].mxu1 %vm327_vm0, %v1082_v45 }
 0x212   : > { %2351 = vmatprep.mubr.msk.f32.mxu1 %vm327_vm0, %v1113_v46 }
 0x214   : > { %v1114_v47 = vpop.trf.xlu0  ;;  %v1145_v48 = vpop.trf.xlu1 }
 0x215   : > { %2352 = vmatmul.mubr.msk.f32.gmra.mrb[16].mxu1 %vm327_vm0, %v1114_v47 }
 0x216   : > { %2354 = vmatprep.mubr.msk.f32.mxu1 %vm327_vm0, %v1145_v48 }
 0x218   : > { %v1146_v49 = vpop.trf.xlu1  ;;  %v1177_v50 = vpop.trf.xlu0 }
 0x219   : > { %2355 = vmatmul.mubr.msk.f32.gmra.mrb[18].mxu1 %vm327_vm0, %v1146_v49 }
 0x21a   : > { %2357 = vmatprep.mubr.msk.f32.mxu1 %vm327_vm0, %v1177_v50 }
 0x21c   : > { %v1178_v51 = vpop.trf.xlu0  ;;  %v1209_v52 = vpop.trf.xlu1 }
 0x21d   : > { %2358 = vmatmul.mubr.msk.f32.gmra.mrb[20].mxu1 %vm327_vm0, %v1178_v51 }
 0x21e   : > { %2360 = vmatprep.mubr.msk.f32.mxu1 %vm327_vm0, %v1209_v52 }
 0x220   : > { %v1210_v53 = vpop.trf.xlu1  ;;  %v1241_v54 = vpop.trf.xlu0 }
 0x221   : > { %2361 = vmatmul.mubr.msk.f32.gmra.mrb[22].mxu1 %vm327_vm0, %v1210_v53 }
 0x222   : > { %2363 = vmatprep.mubr.msk.f32.mxu1 %vm327_vm0, %v1241_v54 }
 0x224   : > { %v1242_v55 = vpop.trf.xlu0  ;;  %v1273_v56 = vpop.trf.xlu1 }
 0x225   : > { %2364 = vmatmul.mubr.msk.f32.gmra.mrb[24].mxu1 %vm327_vm0, %v1242_v55 }
 0x226   : > { %2366 = vmatprep.mubr.msk.f32.mxu1 %vm327_vm0, %v1273_v56 }
 0x228   : > { %v1274_v57 = vpop.trf.xlu1  ;;  %v1305_v58 = vpop.trf.xlu0 }
 0x229   : > { %2367 = vmatmul.mubr.msk.f32.gmra.mrb[26].mxu1 %vm327_vm0, %v1274_v57 }
 0x22a   : > { %2369 = vmatprep.mubr.msk.f32.mxu1 %vm327_vm0, %v1305_v58 }
 0x22c   : > { %v1306_v59 = vpop.trf.xlu0  ;;  %v1337_v60 = vpop.trf.xlu1 }
 0x22d   : > { %2370 = vmatmul.mubr.msk.f32.gmra.mrb[28].mxu1 %vm327_vm0, %v1306_v59 }
 0x22e   : > { %2372 = vmatprep.mubr.msk.f32.mxu1 %vm327_vm0, %v1337_v60 }
 0x230   : > { %v1338_v61 = vpop.trf.xlu1 }
 0x231   : > { %2373 = vmatmul.mubr.msk.f32.gmra.mrb[30].mxu1 %vm327_vm0, %v1338_v61 }
 0x2b8   : > { %v2317_v62 = vpop.f32.mrb[0].mxu1 }
 0x2b9   : > { %v1541_v63 = vpop.f32.mrb[1].mxu1  ;;  %v1749_v7 = vmul.f32 %v2317_v62, %v2317_v62 }
 0x2ba   : > { %v1748_v11 = vmul.f32 %v1541_v63, %v1541_v63 }
 0x2bc   : > { %v2320_v0 = vpop.f32.mrb[2].mxu1 }
 0x2bd   : > { %v1551_v1 = vpop.f32.mrb[3].mxu1  ;;  %v1751_v17 = vmul.f32 %v2320_v0, %v2320_v0 }
 0x2be   : > { %v1750_v21 = vmul.f32 %v1551_v1, %v1551_v1 }
 0x2c0   : > { %v2323_v2 = vpop.f32.mrb[4].mxu1 }
 0x2c1   : > { %v1561_v3 = vpop.f32.mrb[5].mxu1  ;;  %v1753_v27 = vmul.f32 %v2323_v2, %v2323_v2 }
 0x2c2   : > { %v1752_v31 = vmul.f32 %v1561_v3, %v1561_v3 }
 0x2c4   : > { %v2326_v4 = vpop.f32.mrb[6].mxu1 }
 0x2c5   : > { %v1571_v5 = vpop.f32.mrb[7].mxu1  ;;  %v1755_v37 = vmul.f32 %v2326_v4, %v2326_v4 }
 0x2c6   : > { %v1754_v41 = vmul.f32 %v1571_v5, %v1571_v5 }
 0x2c8   : > { %v2329_v6 = vpop.f32.mrb[8].mxu1 }
 0x2c9   : > { %v3012_v8 = vmul.f32 %v2329_v6, %v2317_v62  ;;  %v1757_v9 = vmul.f32 %v2329_v6, %v2329_v6  ;;  %v1581_v10 = vpop.f32.mrb[9].mxu1 }
 0x2ca   : > { %v3014_v12 = vmul.f32 %v1581_v10, %v1541_v63  ;;  %v1756_v13 = vmul.f32 %v1581_v10, %v1581_v10 }
 0x2cb   : > { %v1765_v14 = vadd.f32 %v1757_v9, %v1749_v7  ;;  %v1773_v60 = vmul.f32 2.0, %v3012_v8 }
 0x2cc   : > { %v2332_v15 = vpop.f32.mrb[10].mxu1  ;;  %v1764_v16 = vadd.f32 %v1756_v13, %v1748_v11 }
 0x2cd   : > { %v3016_v18 = vmul.f32 %v2332_v15, %v2320_v0  ;;  %v1759_v19 = vmul.f32 %v2332_v15, %v2332_v15  ;;  %v1591_v20 = vpop.f32.mrb[11].mxu1  ;;  %v1821_v50 = vadd.f32 0.0001, %v1765_v14  ;;  %v1781_v9 = vadd.f32 0.0001, %v1773_v60 }
 0x2ce   : > { %v3018_v22 = vmul.f32 %v1591_v20, %v1551_v1  ;;  %v1758_v23 = vmul.f32 %v1591_v20, %v1591_v20  ;;  %v1820_v52 = vadd.f32 0.0001, %v1764_v16 }
 0x2cf   : > { %v1767_v24 = vadd.f32 %v1759_v19, %v1751_v17 }
 0x2d0   : > { %v2335_v25 = vpop.f32.mrb[12].mxu1  ;;  %v1766_v26 = vadd.f32 %v1758_v23, %v1750_v21  ;;  %v1774_v17 = vmul.f32 2.0, %v3018_v22 }
 0x2d1   : > { %v3020_v28 = vmul.f32 %v2335_v25, %v2323_v2  ;;  %v1761_v29 = vmul.f32 %v2335_v25, %v2335_v25  ;;  %v1601_v30 = vpop.f32.mrb[13].mxu1  ;;  %v1823_v61 = vadd.f32 0.0001, %v1767_v24 }
 0x2d2   : > { %v3022_v32 = vmul.f32 %v1601_v30, %v1561_v3  ;;  %v1760_v33 = vmul.f32 %v1601_v30, %v1601_v30  ;;  %v1822_v63 = vadd.f32 0.0001, %v1766_v26 }
 0x2d3   : > { %v1769_v34 = vadd.f32 %v1761_v29, %v1753_v27 }
 0x2d4   : > { %v2338_v35 = vpop.f32.mrb[14].mxu1  ;;  %v1768_v36 = vadd.f32 %v1760_v33, %v1752_v31  ;;  %v1776_v27 = vmul.f32 2.0, %v3022_v32 }
 0x2d5   : > { %v3024_v38 = vmul.f32 %v2338_v35, %v2326_v4  ;;  %v1763_v39 = vmul.f32 %v2338_v35, %v2338_v35  ;;  %v1611_v40 = vpop.f32.mrb[15].mxu1  ;;  %v1825_v10 = vadd.f32 0.0001, %v1769_v34 }
 0x2d6   : > { %v3026_v42 = vmul.f32 %v1611_v40, %v1571_v5  ;;  %v1762_v43 = vmul.f32 %v1611_v40, %v1611_v40  ;;  %v1772_v5 = vmul.f32 2.0, %v3014_v12  ;;  %v1824_v13 = vadd.f32 0.0001, %v1768_v36 }
 0x2d7   : > { %v1771_v44 = vadd.f32 %v1763_v39, %v1755_v37  ;;  %v1782_v37 = vadd.f32 0.0001, %v1774_v17 }
 0x2d8   : > { %v1770_v45 = vadd.f32 %v1762_v43, %v1754_v41  ;;  %v1780_v23 = vadd.f32 0.0001, %v1772_v5 }
 0x2d9   : > { %v1827_v29 = vadd.f32 0.0001, %v1771_v44 }
 0x2da   : > { %v1826_v31 = vadd.f32 0.0001, %v1770_v45 }
 0x2e8   : > { %v2353_v46 = vpop.f32.mrb[16].mxu1 }
 0x2e9   : > { %v1837_v47 = vsub.f32 %v2353_v46, %v1765_v14  ;;  %v1661_v48 = vpop.f32.mrb[17].mxu1 }
 0x2ea   : > { %v1836_v49 = vsub.f32 %v1661_v48, %v1764_v16  ;;  %v1775_v16 = vmul.f32 2.0, %v3016_v18 }
 0x2eb   : > { %v1845_v51 = vadd.f32 0.0009, %v1837_v47 }
 0x2ec   : > { %v1844_v53 = vadd.f32 0.0009, %v1836_v49  ;;  %v2356_v54 = vpop.f32.mrb[18].mxu1  ;;  %v3042_v49 = vadd.f32 0.0001, %v1776_v27 }
 0x2ed   : > { %v1853_v55 = vmul.f32 %v1845_v51, %v1821_v50  ;;  %v1839_v56 = vsub.f32 %v2356_v54, %v1767_v24  ;;  %v1671_v57 = vpop.f32.mrb[19].mxu1  ;;  %v1777_v24 = vmul.f32 2.0, %v3020_v28  ;;  %v1779_v51 = vmul.f32 2.0, %v3024_v38 }
 0x2ee   : > { %v1852_v58 = vmul.f32 %v1844_v53, %v1820_v52  ;;  %v1838_v59 = vsub.f32 %v1671_v57, %v1766_v26 }
 0x2ef   : > { %2459 = vrcp.f32 %v1853_v55  ;;  %v1847_v62 = vadd.f32 0.0009, %v1839_v56  ;;  %v3037_v46 = vadd.f32 0.0001, %v1777_v24  ;;  %v1787_v5 = vadd.f32 0.0001, %v1779_v51 }
 0x2f0   : > { %2461 = vrcp.f32 %v1852_v58  ;;  %v1846_v0 = vadd.f32 0.0009, %v1838_v59  ;;  %v2359_v1 = vpop.f32.mrb[20].mxu1 }
 0x2f1   : > { %v1855_v2 = vmul.f32 %v1847_v62, %v1823_v61  ;;  %v1841_v3 = vsub.f32 %v2359_v1, %v1769_v34  ;;  %v1681_v4 = vpop.f32.mrb[21].mxu1 }
 0x2f2   : > { %v1854_v6 = vmul.f32 %v1846_v0, %v1822_v63  ;;  %v1840_v7 = vsub.f32 %v1681_v4, %v1768_v36  ;;  %v1783_v36 = vadd.f32 0.0001, %v1775_v16 }
 0x2f3   : > { %2463 = vrcp.f32 %v1855_v2  ;;  %v1849_v11 = vadd.f32 0.0009, %v1841_v3 }
 0x2f4   : > { %2465 = vrcp.f32 %v1854_v6  ;;  %v1848_v14 = vadd.f32 0.0009, %v1840_v7  ;;  %v2362_v15 = vpop.f32.mrb[22].mxu1 }
 0x2f5   : > { %v1857_v19 = vmul.f32 %v1849_v11, %v1825_v10  ;;  %v1843_v20 = vsub.f32 %v2362_v15, %v1771_v44  ;;  %v1691_v21 = vpop.f32.mrb[23].mxu1 }
 0x2f6   : > { %v1856_v25 = vmul.f32 %v1848_v14, %v1824_v13  ;;  %v1842_v26 = vsub.f32 %v1691_v21, %v1770_v45 }
 0x2f7   : > { %2467 = vrcp.f32 %v1857_v19  ;;  %v1851_v30 = vadd.f32 0.0009, %v1843_v20 }
 0x2f8   : > { %2469 = vrcp.f32 %v1856_v25  ;;  %v1850_v33 = vadd.f32 0.0009, %v1842_v26  ;;  %v2365_v34 = vpop.f32.mrb[24].mxu1 }
 0x2f9   : > { %v2460_v35 = vpop.eup %2459  ;;  %v3034_v39 = vmul.f32 %v1851_v30, %v1827_v29  ;;  %v1789_v40 = vsub.f32 %v2365_v34, %v3012_v8  ;;  %v1701_v41 = vpop.f32.mrb[25].mxu1 }
 0x2fa   : > { %v2462_v43 = vpop.eup %2461  ;;  %v1869_v47 = vmul.f32 %v2460_v35, %v1853_v55  ;;  %v3039_v48 = vmul.f32 %v1850_v33, %v1826_v31  ;;  %v1788_v44 = vsub.f32 %v1701_v41, %v3014_v12  ;;  %v3048_v55 = vmul.f32 2.0, %v3026_v42 }
 0x2fb   : > { %v1868_v45 = vmul.f32 %v2462_v43, %v1852_v58  ;;  %2471 = vrcp.f32 %v3034_v39  ;;  %v1797_v50 = vmul.f32 2.0, %v1789_v40 }
 0x2fc   : > { %v1877_v52 = vsub.f32 2.0, %v1869_v47  ;;  %2473 = vrcp.f32 %v3039_v48  ;;  %v1796_v8 = vmul.f32 2.0, %v1788_v44  ;;  %v2368_v53 = vpop.f32.mrb[26].mxu1 }
 0x2fd   : > { %v2464_v54 = vpop.eup %2463  ;;  %v1876_v56 = vsub.f32 2.0, %v1868_v45  ;;  %v1805_v57 = vadd.f32 0.0009, %v1797_v50  ;;  %v1791_v12 = vsub.f32 %v2368_v53, %v3016_v18  ;;  %v1711_v59 = vpop.f32.mrb[27].mxu1 }
 0x2fe   : > { %v2466_v58 = vpop.eup %2465  ;;  %v1871_v60 = vmul.f32 %v2464_v54, %v1855_v2  ;;  %v1804_v61 = vadd.f32 0.0009, %v1796_v8  ;;  %v1790_v62 = vsub.f32 %v1711_v59, %v3018_v22  ;;  %v1885_v63 = vmul.f32 %v2460_v35, %v1877_v52 }
 0x2ff   : > { %v1870_v0 = vmul.f32 %v2466_v58, %v1854_v6  ;;  %v1813_v1 = vmul.f32 %v1805_v57, %v1781_v9  ;;  %v1799_v3 = vmul.f32 2.0, %v1791_v12  ;;  %v1884_v4 = vmul.f32 %v2462_v43, %v1876_v56 }
 0x300   : > { %v1879_v7 = vsub.f32 2.0, %v1871_v60  ;;  %v1812_v10 = vmul.f32 %v1804_v61, %v1780_v23  ;;  %v1798_v11 = vmul.f32 2.0, %v1790_v62  ;;  %v2371_v13 = vpop.f32.mrb[28].mxu1  ;;  %v1786_v12 = vadd.f32 0.0001, %v3048_v55 }
 0x301   : > { %v2468_v14 = vpop.eup %2467  ;;  %v1878_v15 = vsub.f32 2.0, %v1870_v0  ;;  %v1807_v16 = vadd.f32 0.0009, %v1799_v3  ;;  %v1793_v18 = vsub.f32 %v2371_v13, %v3020_v28  ;;  %v1721_v17 = vpop.f32.mrb[29].mxu1  ;;  %v1893_v2 = vmul.f32 %v1885_v63, %v1813_v1 }
 0x302   : > { %v2470_v20 = vpop.eup %2469  ;;  %v1873_v21 = vmul.f32 %v2468_v14, %v1857_v19  ;;  %v1806_v22 = vadd.f32 0.0009, %v1798_v11  ;;  %v1792_v6 = vsub.f32 %v1721_v17, %v3022_v32  ;;  %v1892_v9 = vmul.f32 %v1884_v4, %v1812_v10 }
 0x303   : > { %v1872_v24 = vmul.f32 %v2470_v20, %v1856_v25  ;;  %v1815_v26 = vmul.f32 %v1807_v16, %v1783_v36  ;;  %v1801_v27 = vmul.f32 2.0, %v1793_v18  ;;  %v1903_v23 = vsel %vm327_vm0, %v1893_v2, 0.0 }
 0x304   : > { %v1881_v29 = vsub.f32 2.0, %v1873_v21  ;;  %v1814_v30 = vmul.f32 %v1806_v22, %v1782_v37  ;;  %v1800_v31 = vmul.f32 2.0, %v1792_v6  ;;  %1904 = vadd.xlane.f32.xlu1 %v1903_v23  ;;  %v2374_v33 = vpop.f32.mrb[30].mxu1  ;;  %v1900_v28 = vsel %vm327_vm0, %v1892_v9, 0.0 }
 0x305   : > { %v2472_v34 = vpop.eup %2471  ;;  %v1880_v35 = vsub.f32 2.0, %v1872_v24  ;;  %v1809_v40 = vadd.f32 0.0009, %v1801_v27  ;;  %v1795_v19 = vsub.f32 %v2374_v33, %v3024_v38  ;;  %1901 = vadd.xlane.f32.xlu0 %v1900_v28  ;;  %v1731_v32 = vpop.f32.mrb[31].mxu1  ;;  %v1887_v41 = vmul.f32 %v2464_v54, %v1879_v7 }
 0x306   : > { %v2474_v25 = vpop.eup %2473  ;;  %v1875_v36 = vmul.f32 %v2472_v34, %v3034_v39  ;;  %v1808_v43 = vadd.f32 0.0009, %v1800_v31  ;;  %v1794_v47 = vsub.f32 %v1731_v32, %v3026_v42  ;;  %v1886_v37 = vmul.f32 %v2466_v58, %v1878_v15 }
 0x307   : > { %v1874_v44 = vmul.f32 %v2474_v25, %v3039_v48  ;;  %v1817_v45 = vmul.f32 %v1809_v40, %v3037_v46  ;;  %v1803_v50 = vmul.f32 2.0, %v1795_v19  ;;  %v1895_v51 = vmul.f32 %v1887_v41, %v1815_v26 }
 0x308   : > { %v1883_v52 = vsub.f32 2.0, %v1875_v36  ;;  %v1816_v8 = vmul.f32 %v1808_v43, %v3042_v49  ;;  %v1802_v38 = vmul.f32 2.0, %v1794_v47  ;;  %v1894_v53 = vmul.f32 %v1886_v37, %v1814_v30 }
 0x309   : > { %v1882_v56 = vsub.f32 2.0, %v1874_v44  ;;  %v1811_v54 = vadd.f32 0.0009, %v1803_v50  ;;  %v1909_v57 = vsel %vm327_vm0, %v1895_v51, 0.0  ;;  %v1888_v39 = vmul.f32 %v2470_v20, %v1880_v35 }
 0x30a   : > { %v1810_v42 = vadd.f32 0.0009, %v1802_v38  ;;  %1910 = vadd.xlane.f32.xlu1 %v1909_v57  ;;  %v1889_v59 = vmul.f32 %v2468_v14, %v1881_v29  ;;  %v1891_v48 = vmul.f32 %v2472_v34, %v1883_v52  ;;  %v1906_v49 = vsel %vm327_vm0, %v1894_v53, 0.0 }
 0x30b   : > { %v1819_v58 = vmul.f32 %v1811_v54, %v1787_v5  ;;  %v1896_v46 = vmul.f32 %v1888_v39, %v1816_v8  ;;  %v1890_v60 = vmul.f32 %v2474_v25, %v1882_v56 }
 0x30c   : > { %v1818_v61 = vmul.f32 %v1810_v42, %v1786_v12  ;;  %v1897_v62 = vmul.f32 %v1889_v59, %v1817_v45 }
 0x30d   : > { %v1912_v63 = vsel %vm327_vm0, %v1896_v46, 0.0  ;;  %v1899_v0 = vmul.f32 %v1891_v48, %v1819_v58 }
 0x30e   : > { %1907 = vadd.xlane.f32.xlu1 %v1906_v49  ;;  %1913 = vadd.xlane.f32.xlu0 %v1912_v63  ;;  %v1898_v1 = vmul.f32 %v1890_v60, %v1818_v61  ;;  %v1915_v3 = vsel %vm327_vm0, %v1897_v62, 0.0 }
 0x30f   : > { %v1921_v4 = vsel %vm327_vm0, %v1899_v0, 0.0 }
 0x310   : > { %v1918_v55 = vsel %vm327_vm0, %v1898_v1, 0.0 }
 0x312   : > { %1916 = vadd.xlane.f32.xlu1 %v1915_v3  ;;  %1919 = vadd.xlane.f32.xlu0 %v1918_v55 }
 0x316   : > { %1922 = vadd.xlane.f32.xlu1 %v1921_v4 }
 0x391   : > { %v1905_v5 = vpop.xlane.xlu1 %1904 }
 0x392   : > { %v1902_v7 = vpop.xlane.xlu0 %1901 }
 0x393   : > { %v1924_v10 = vadd.f32 %v1905_v5, %v1902_v7 }
 0x395   : > { %v1925_v11 = vrot.slane %v1924_v10, 4 }
 0x397   : > { %v1926_v13 = vadd.f32 %v1925_v11, %v1924_v10  ;;  %v1911_v14 = vpop.xlane.xlu1 %1910 }
 0x399   : > { %v1927_v15 = vrot.slane %v1926_v13, 2 }
 0x39b   : > { %v1928_v16 = vadd.f32 %v1927_v15, %v1926_v13  ;;  %v1908_v18 = vpop.xlane.xlu1 %1907  ;;  %v1914_v20 = vpop.xlane.xlu0 %1913 }
 0x39c   : > { %v1931_v17 = vadd.f32 %v1911_v14, %v1908_v18 }
 0x39d   : > { %v1929_v2 = vrot.slane %v1928_v16, 1 }
 0x39e   : > { %v1932_v21 = vrot.slane %v1931_v17, 4 }
 0x39f   : > { %v1930_v22 = vadd.f32 %v1929_v2, %v1928_v16  ;;  %v1917_v6 = vpop.xlane.xlu1 %1916  ;;  %v1920_v23 = vpop.xlane.xlu0 %1919 }
 0x3a0   : > { %v1933_v9 = vadd.f32 %v1932_v21, %v1931_v17  ;;  %v1938_v24 = vadd.f32 %v1917_v6, %v1914_v20 }
 0x3a1   : > { %1953 = vst.msk [vmem:[%s283_s29] sm:$0x1] %vm1952_vm1, %v1930_v22 }
 0x3a2   : > { %v1934_v26 = vrot.slane %v1933_v9, 2  ;;  %v1939_v27 = vrot.slane %v1938_v24, 4 }
 0x3a3   : > { %v1923_v29 = vpop.xlane.xlu1 %1922 }
 0x3a4   : > { %v1935_v30 = vadd.f32 %v1934_v26, %v1933_v9  ;;  %v1940_v31 = vadd.f32 %v1939_v27, %v1938_v24  ;;  %v1945_v33 = vadd.f32 %v1923_v29, %v1920_v23 }
 0x3a6   : > { %v1936_v28 = vrot.slane %v1935_v30, 1  ;;  %v1941_v34 = vrot.slane %v1940_v31, 2  ;;  %v1946_v35 = vrot.slane %v1945_v33, 4 }
 0x3a8   : > { %v1937_v40 = vadd.f32 %v1936_v28, %v1935_v30  ;;  %v1942_v19 = vadd.f32 %v1941_v34, %v1940_v31  ;;  %v1947_v32 = vadd.f32 %v1946_v35, %v1945_v33 }
 0x3aa   : > { %1954 = vst.msk [vmem:[%s283_s29 + $0x1] sm:$0x1] %vm1952_vm1, %v1937_v40  ;;  %v1943_v41 = vrot.slane %v1942_v19, 1  ;;  %v1948_v25 = vrot.slane %v1947_v32, 2 }
 0x3ac   : > { %v1944_v36 = vadd.f32 %v1943_v41, %v1942_v19  ;;  %v1949_v43 = vadd.f32 %v1948_v25, %v1947_v32 }
 0x3ae   : > { %1955 = vst.msk [vmem:[%s283_s29 + $0x2] sm:$0x1] %vm1952_vm1, %v1944_v36  ;;  %v1950_v47 = vrot.slane %v1949_v43, 1 }
 0x3b0   : > { %v1951_v37 = vadd.f32 %v1950_v47, %v1949_v43 }
 0x3b2   : > { %1956 = vst.msk [vmem:[%s283_s29 + $0x3] sm:$0x1] %vm1952_vm1, %v1951_v37 }
 0x3b3 PF: > { %p13_p4 = scmp.ge.s32.totalorder %s2688_s20, 4   ;;  %s3119_s15 = smov %s2625_s16 }
 0x3b4   : > { %s3120_s16 = smov %s2629_s17  ;;  %s3121_s17 = smov %s2698_s23 }
 0x3b5   : > { %s3122_s18 = smov %s2688_s20  ;;  %15 = sbr.rel (!%p13_p4) target bundleno = 3 (0x3), region = 94 }
 0x3bc   :  { %1977 = vsyncpa [#allocation3], 1 }
 0x3bd   :  { %1979 = vsyncpa [#allocation3 + $0x1], 1 }
 0x3be   :  { %1980 = vsyncpa [#allocation5], 1 }

</bundles_post_ra>
